<compile_context>
chip_gen: v5e
topology: v5e:2x2
jax: 0.10.0
libtpu: 0.0.40
codegen_flags: <defaults>
</compile_context>

<pallas_src>
import functools

import numpy as np
import jax
import jax.numpy as jnp
from jax import lax
from jax.experimental import pallas as pl
from jax.experimental.pallas import tpu as pltpu

EPS = 1e-5        # InstanceNorm1d default eps
NEG_BIG = -1e30   # additive mask for padded softmax entries


@functools.lru_cache(maxsize=1)
def _roll_moves_right():
    """True iff pltpu.roll(x, 1, axis) follows np.roll semantics (y[i] = x[i-1]).

    One-time tiny probe so the main kernel is robust to either rotate
    convention of the underlying hardware rotate op.
    """
    def probe(x_ref, o_ref):
        o_ref[...] = pltpu.roll(x_ref[...], shift=1, axis=1)

    x = jnp.broadcast_to(jnp.arange(128, dtype=jnp.float32), (8, 128))
    y = pl.pallas_call(
        probe, out_shape=jax.ShapeDtypeStruct((8, 128), jnp.float32))(x)
    return bool(jax.device_get(y[0, 1]) == 0.0)


def _pick_batch_block(batch, max_bt=4):
    """Largest divisor of `batch` (<= max_bt) that leaves >= 2 grid steps."""
    if batch <= 1:
        return 1
    best = 1
    for cand in range(1, min(batch // 2, max_bt) + 1):
        if batch % cand == 0:
            best = cand
    return best


def _make_kernel(C, K, HW, HWp, Bt):
    """Build the per-grid-step kernel; all sizes are static Python ints."""
    scale = float(K) ** -0.5
    padded = HWp != HW
    if _roll_moves_right():
        prev_shift, next_shift = 1, HWp - 1
    else:
        prev_shift, next_shift = HWp - 1, 1

    def kernel(ml_ref, wproj_ref, wcat_ref, o_ref):
        wproj = wproj_ref[...]            # (2K, 2C)  blockdiag(wq, wk)
        wcat = wcat_ref[...]              # (C, 6K)   [wW tap0 | tap1 | tap2]

        # Loop-invariant masks, hoisted (JAX does not CSE broadcast_in_dim).
        lane2k = lax.broadcasted_iota(jnp.int32, (2 * K, HWp), 1)
        first_col = lane2k == 0           # conv zero pad at t = -1
        last_col = lane2k == HW - 1       # conv zero pad at t = HW
        if padded:
            valid1 = (lax.broadcasted_iota(jnp.int32, (1, HWp), 1)
                      < HW).astype(jnp.float32)
            key_ok = lax.broadcasted_iota(jnp.int32, (HWp, HWp), 1) < HW
            qry_ok = lax.broadcasted_iota(jnp.int32, (HWp, HWp), 0) < HW

        def inorm(x):
            # InstanceNorm1d (affine=False), masked to the true length HW.
            if not padded:
                mu = jnp.mean(x, axis=-1, keepdims=True)
                d = x - mu
                var = jnp.mean(d * d, axis=-1, keepdims=True)
                return d * lax.rsqrt(var + EPS)
            inv_n = 1.0 / HW
            mu = jnp.sum(x * valid1, axis=-1, keepdims=True) * inv_n
            d = (x - mu) * valid1
            var = jnp.sum(d * d, axis=-1, keepdims=True) * inv_n
            return (x - mu) * lax.rsqrt(var + EPS)

        for b in range(Bt):               # small static batch block (unrolled)
            ml = ml_ref[b]                # (2C, HWp)  [M ; L], zero padded

            # f_query / f_key: fused 1x1 conv (block-diag) + InstanceNorm.
            # (biases dropped: per-channel constants cancel inside the norm)
            proj = inorm(jnp.dot(wproj, ml, preferred_element_type=jnp.float32))
            mq = proj[:K, :]              # (K, HWp) query features
            lk = proj[K:, :]              # (K, HWp) key features
            mq_s = mq * scale             # scale (K,HWp), not the (HWp,HWp) sim

            # sim_map and its two softmaxes (padded rows / cols masked out).
            sim = jnp.dot(mq_s.T, lk, preferred_element_type=jnp.float32)
            sim_r = jnp.where(key_ok, sim, NEG_BIG) if padded else sim
            sim_c = jnp.where(qry_ok, sim, NEG_BIG) if padded else sim

            r_max = jnp.max(sim_r, axis=-1, keepdims=True)
            r_exp = jnp.exp(sim_r - r_max)
            s1 = r_exp * pl.reciprocal(
                jnp.sum(r_exp, axis=-1, keepdims=True), approx=True)

            c_max = jnp.max(sim_c, axis=0, keepdims=True)
            c_exp = jnp.exp(sim_c - c_max)
            s0 = c_exp * pl.reciprocal(
                jnp.sum(c_exp, axis=0, keepdims=True), approx=True)

            # Lp / Mp stored transposed as (K, HWp); cat == torch.cat([Lp,Mp],-1).T
            lp_t = jnp.dot(lk, s1.T, preferred_element_type=jnp.float32)
            mp_t = jnp.dot(mq, s0, preferred_element_type=jnp.float32)
            cat = jnp.concatenate([lp_t, mp_t], axis=0)            # (2K, HWp)

            # k=3 Conv1d(2C->C, padding=1): lane shifts on the XLU + one matmul.
            cat_prev = jnp.where(first_col, 0.0,
                                 pltpu.roll(cat, shift=prev_shift, axis=1))
            cat_next = jnp.where(last_col, 0.0,
                                 pltpu.roll(cat, shift=next_shift, axis=1))
            stacked = jnp.concatenate([cat_prev, cat, cat_next], axis=0)  # (6K, HWp)

            out = inorm(jnp.dot(wcat, stacked,
                                preferred_element_type=jnp.float32))  # (C, HWp)
            o_ref[b] = out

    return kernel


def efn_attention(M, L, params, max_batch_block=4):
    """M, L: (B, C, HW) float32.  Returns (B, HW, C) like the PyTorch module."""
    B, C, HW = M.shape
    K = params["wq"].shape[0]
    assert K == C, "module requires key_channels == in_channels (W expects 2*C inputs)"
    # TODO(synk): AvgPool2d / bilinear Upsample branch (only taken when HW > 225)
    # is not implemented; this wrapper handles the HW <= 225 path.
    assert HW <= 225

    HWp = ((HW + 127) // 128) * 128          # lane-dense sequence length
    Bt = _pick_batch_block(B, max_batch_block)
    grid = (B // Bt,)

    f32 = jnp.float32
    wq = params["wq"].astype(f32)
    wk = params["wk"].astype(f32)
    wW = params["wW"].astype(f32)
    zeros_kc = jnp.zeros((K, C), f32)
    # blockdiag(wq, wk): one projection matmul covers both f_query and f_key.
    w_proj = jnp.concatenate(
        [jnp.concatenate([wq, zeros_kc], axis=1),
         jnp.concatenate([zeros_kc, wk], axis=1)], axis=0)           # (2K, 2C)
    # [tap(t-1) | tap(t) | tap(t+1)] of the k=3 conv, each (C, 2K).
    w_cat = jnp.concatenate([wW[:, :, 0], wW[:, :, 1], wW[:, :, 2]], axis=1)
    # NOTE: bq / bk / bW are not passed: each is a per-channel constant added
    # right before an InstanceNorm over the length dim, so it cancels exactly.

    ml = jnp.concatenate([M.astype(f32), L.astype(f32)], axis=1)     # (B, 2C, HW)
    if HWp != HW:
        ml = jnp.pad(ml, ((0, 0), (0, 0), (0, HWp - HW)))

    out = pl.pallas_call(
        _make_kernel(C, K, HW, HWp, Bt),
        out_shape=jax.ShapeDtypeStruct((B, C, HWp), f32),
        grid=grid,
        in_specs=[
            pl.BlockSpec((Bt, 2 * C, HWp), lambda g: (g, 0, 0)),     # [M;L]
            pl.BlockSpec((2 * K, 2 * C), lambda g: (0, 0)),          # w_proj
            pl.BlockSpec((C, 6 * K), lambda g: (0, 0)),              # w_cat
        ],
        out_specs=pl.BlockSpec((Bt, C, HWp), lambda g: (g, 0, 0)),
        compiler_params=pltpu.CompilerParams(
            dimension_semantics=("parallel",)),
    )(ml, w_proj, w_cat)

    out = out[:, :, :HW]
    # The module returns (B, HW, C); the transpose stays outside the kernel so
    # consumers that accept the lane-dense (B, C, HW) layout can skip it.
    return jnp.transpose(out, (0, 2, 1))


def ref_forward(M, L, params):
    """Pure-JAX reference of the PyTorch forward (HW <= 225 path), incl. biases."""
    B, C, HW = M.shape
    wq, bq = params["wq"], params["bq"]
    wk, bk = params["wk"], params["bk"]
    wW, bW = params["wW"], params["bW"]
    K = wq.shape[0]

    def conv1x1(x, w, b):
        return jnp.einsum("oc,bcl->bol", w, x) + b[None, :, None]

    def inorm(x):
        mu = jnp.mean(x, -1, keepdims=True)
        var = jnp.mean((x - mu) ** 2, -1, keepdims=True)
        return (x - mu) / jnp.sqrt(var + EPS)

    Mq = inorm(conv1x1(M, wq, bq))
    Lk = inorm(conv1x1(L, wk, bk))
    sim = jnp.einsum("bkq,bkl->bql", Mq, Lk) * (K ** -0.5)
    s1 = jax.nn.softmax(sim, axis=-1)
    s2 = jnp.swapaxes(jax.nn.softmax(sim, axis=-2), 1, 2)
    Lp = jnp.einsum("bqs,bks->bqk", s1, Lk)
    Mp = jnp.einsum("bqs,bks->bqk", s2, Mq)
    cat = jnp.concatenate([Lp, Mp], axis=-1)           # (B, HW, 2K)
    x = jnp.swapaxes(cat, 1, 2)                        # (B, 2K, HW)
    zp = jnp.zeros((B, 2 * K, 1), x.dtype)
    xprev = jnp.concatenate([zp, x[:, :, :-1]], axis=-1)
    xnext = jnp.concatenate([x[:, :, 1:], zp], axis=-1)
    out = (jnp.einsum("oc,bcl->bol", wW[:, :, 0], xprev)
           + jnp.einsum("oc,bcl->bol", wW[:, :, 1], x)
           + jnp.einsum("oc,bcl->bol", wW[:, :, 2], xnext)
           + bW[None, :, None])
    out = inorm(out)
    return jnp.swapaxes(out, 1, 2)                     # (B, HW, C)


def init_params(key, in_channels, key_channels):
    C, K = in_channels, key_channels
    ks = jax.random.split(key, 6)

    def u(k, shape, fan_in):
        bound = 1.0 / np.sqrt(fan_in)
        return jax.random.uniform(k, shape, jnp.float32, -bound, bound)

    return {
        "wq": u(ks[0], (K, C), C), "bq": u(ks[1], (K,), C),
        "wk": u(ks[2], (K, C), C), "bk": u(ks[3], (K,), C),
        "wW": u(ks[4], (C, 2 * C, 3), 2 * C * 3),
        "bW": u(ks[5], (C,), 2 * C * 3),
    }


if __name__ == "__main__":
    key = jax.random.PRNGKey(0)
    # Config 1 exercises the padded path (HW=64 -> 128 lanes, masked reductions);
    # config 2 exercises the exact-multiple-of-128 path and Bt=2 batch blocking.
    for (B, C, HW) in [(2, 8, 64), (4, 8, 128)]:
        K = C
        k_params, k_m, k_l, key = jax.random.split(key, 4)
        params = init_params(k_params, C, K)
        M = jax.random.normal(k_m, (B, C, HW), jnp.float32)
        L = jax.random.normal(k_l, (B, C, HW), jnp.float32)

        out = jax.block_until_ready(efn_attention(M, L, params))
        ref = jax.block_until_ready(ref_forward(M, L, params))

        # Slightly looser than exact-math tolerance: the softmax denominators
        # use the approximate EUP reciprocal.
        np.testing.assert_allclose(np.asarray(out), np.asarray(ref),
                                   rtol=5e-3, atol=5e-3)
        assert out.shape == (B, HW, C)

    print("KERNEL_OK")
</pallas_src>

<mosaic_0001>
module attributes {stable_mosaic.version = 11 : i64} {
  func.func @probe(%arg0: memref<8x128xf32, #tpu.memory_space<vmem>>, %arg1: memref<8x128xf32, #tpu.memory_space<vmem>>) attributes {dimension_semantics = [], scalar_prefetch = 0 : i64, scratch_operands = 0 : i64, tpu.core_type = #tpu.core_type<tc>} {
    %c0 = arith.constant 0 : index
    %c0_0 = arith.constant 0 : index
    %0 = vector.load %arg0[%c0, %c0_0] : memref<8x128xf32, #tpu.memory_space<vmem>>, vector<8x128xf32>
    %c1_i32 = arith.constant 1 : i32
    %1 = tpu.dynamic_rotate %0 by %c1_i32 dim 1 : vector<8x128xf32>, i32 -> vector<8x128xf32>
    %c0_1 = arith.constant 0 : index
    %c0_2 = arith.constant 0 : index
    %2 = vector.load %arg1[%c0_1, %c0_2] : memref<8x128xf32, #tpu.memory_space<vmem>>, vector<8x128xf32>
    tpu.vector_store %arg1[%c0_1, %c0_2], %1 {strides = array<i32>} : memref<8x128xf32, #tpu.memory_space<vmem>>, vector<8x128xf32>,
    return
  }
}

</mosaic_0001>

<bundles_post_ra>
// kernel: tpu_custom_call.1
= control target key start
LH: loop header
LB: loop body
LE: loop exit
PB: predicated region body
PF: predicated region fallthrough
CT: control target
= control target key end

     0   :  { %6 = vsyncpa [#allocation3], 0  ;;  %s118_s0 = inlined_call_operand.hbm [shape: f32[8,128], index: 0, kind: input, shape index: {}]   ;;  %s119_s1 = inlined_call_operand.hbm [shape: f32[8,128], index: 1, kind: output, shape index: {}]  }
   0x1   :  { %7 = vsyncpa [#allocation4], 0  ;;  %s13_s8 = sshll.u32 %s118_s0, 4  ;;  %s99_s9 = smov [#allocation2]   ;;  %s14_s8 = int_to_ptr.hbm [resolvable:$true] %s13_s8 }
   0x2   :  { %s15_s10 = sshll.u32 %s99_s9, 4  ;;  %s16_s10 = int_to_ptr.vmem [resolvable:$true] %s15_s10 }
   0x3   :  { %18 = dma.hbm_to_vmem [thread:$0]  %s14_s8, 128, %s16_s10, [#allocation3]  }
   0x4   :  { %95 = dma.done.wait [#allocation3], 128  }
   0x5   :  { %96 = vsyncadd [#allocation3], 4294967168  ;;  %v23_v0 = vld [vmem:[#allocation2] sm:$0xff]  ;;  %s100_s11 = smov 1   ;;  %s101_s12 = smov [#allocation5]  }
   0x6   :  { %24 = vrot.lane.b32.xlu0 %v23_v0, %s100_s11  ;;  %s32_s13 = sshll.u32 %s101_s12, 4  ;;  %s34_s16 = sshll.u32 %s119_s1, 4  ;;  %s33_s13 = int_to_ptr.vmem [resolvable:$true] %s32_s13  ;;  %s35_s16 = int_to_ptr.hbm [resolvable:$true] %s34_s16 }
  0x78   :  { %v25_v1 = vpop.permute.xlu0 %24 }
  0x79   :  { %26 = vst [vmem:[#allocation5] sm:$0xff] %v25_v1 }
  0x7a   :  { %37 = dma.vmem_to_hbm [thread:$0]  %s33_s13, 128, %s35_s16, [#allocation4]  }
  0x7b   :  { %97 = dma.done.wait [#allocation4], 128  }
  0x7c   :  { %98 = vsyncadd [#allocation4], 4294967168 }
  0x7d   :  { %42 = vsyncpa [#allocation3], 1 }
  0x7e   :  { %43 = vsyncpa [#allocation4], 1 }

</bundles_post_ra>
